<compile_context>
chip_gen: v6e
topology: v6e:2x2x1
jax: 0.10.0
libtpu: 0.0.40
codegen_flags: <defaults>
</compile_context>

<pallas_src>
import functools

import jax
import jax.numpy as jnp
from jax.experimental import pallas as pl
from jax.experimental.pallas import tpu as pltpu
import numpy as np


def _cdiv(a, b):
    return -(-a // b)


def _x2_attn_kernel(h_ref, bias_ref, whT_ref, v_ref, out_ref, attn_ref, *,
                    lane_dense_out):
    # h_ref:    (BB, S, H)   BB batch elements per grid step
    # bias_ref: (BB, A)      fused x0/x1 projections + bh (precomputed)
    # whT_ref:  (H, A)       Wh^T
    # v_ref:    (1, A)       V as a row vector
    # out_ref:  (BB, H)  or (H, BB) if lane_dense_out
    # attn_ref: (BB, S)  or (S, BB) if lane_dense_out
    BB, S, H = h_ref.shape
    A = whT_ref.shape[1]

    # Ah = hidden @ Wh^T  -- fold batch*seq into the MXU M dimension.
    h2 = h_ref[...].reshape(BB * S, H)
    Ah = jnp.dot(h2, whT_ref[...],
                 preferred_element_type=jnp.float32)          # [BB*S, A]
    Ah = Ah.reshape(BB, S, A) + bias_ref[...][:, None, :]     # + fused bias

    w = jnp.maximum(Ah, 0.0)                                  # ReLU  [BB, S, A]

    # score = w . v : VPU multiply + lane (XLU) reduction, no N=1 MXU matmul.
    scores = jnp.sum(w * v_ref[...], axis=-1)                 # [BB, S]

    # softmax over the sequence axis (lane-dense layout).
    m = jnp.max(scores, axis=-1, keepdims=True)               # [BB, 1]
    e = jnp.exp(scores - m)                                   # [BB, S]
    denom = jnp.sum(e, axis=-1, keepdims=True)                # [BB, 1]
    p = e * pl.reciprocal(denom, approx=False)                # exact: 1e-5 tol

    # output[b, :] = sum_s p[b, s] * h[b, s, :]
    # Re-read the hidden tile at its point of use (short live range; the first
    # load is dead after the matmul above).
    h3 = h_ref[...].astype(jnp.float32)                       # [BB, S, H]
    out = jnp.sum(p[:, :, None] * h3, axis=1)                 # [BB, H]

    if lane_dense_out:
        # batch on the lane axis: one XLU transpose, unmasked lane-dense store.
        attn_ref[...] = p.T.astype(attn_ref.dtype)            # (S, BB)
        out_ref[...] = out.T.astype(out_ref.dtype)            # (H, BB)
    else:
        attn_ref[...] = p.astype(attn_ref.dtype)              # (BB, S)
        out_ref[...] = out.astype(out_ref.dtype)              # (BB, H)


def _vmem_capacity_bytes():
    try:
        info = pltpu.get_tpu_info()
        cap = int(getattr(info, "vmem_capacity_bytes", 0) or 0)
    except Exception:
        cap = 0
    if cap <= 0:
        cap = 64 << 20  # conservative (v7x per-TensorCore)
    return cap


def x2_self_attention(hidden_states, x0, x1, wh, bh, w0, w1, v, block_b=None):
    """hidden_states [B,S,H]; x0 [B,H0]; x1 [B,H1];
    wh [A,H], bh [A], w0 [A,H0], w1 [A,H1], v [1,A]  (PyTorch Linear layout)."""
    B, S, H = hidden_states.shape
    A = wh.shape[0]
    in_dtype = hidden_states.dtype
    isz = jnp.dtype(in_dtype).itemsize

    # ---- wrapper glue (cheap XLA GEMMs / transposes) ------------------------
    # Fused per-batch bias: x0 @ W0^T + x1 @ W1^T + bh   -> [B, A]
    bias = (jnp.dot(x0, w0.T) + jnp.dot(x1, w1.T) + bh[None, :]).astype(jnp.float32)
    whT = wh.T.astype(in_dtype)                         # [H, A]
    v_row = v.reshape(1, A).astype(jnp.float32)         # [1, A]

    # ---- batch block size from a VMEM/DMA byte budget ------------------------
    cap = _vmem_capacity_bytes()
    per_el = S * H * isz                                # hidden bytes per batch row
    if block_b is None:
        # ~1-4 MiB of hidden tile per pipeline buffer (HBM-roofline-friendly),
        # scaled down on chips with less VMEM (v7x: 64 MiB physical).
        tile_budget = min(4 << 20, max(1 << 20, cap // 24))
        bb = max(8, (tile_budget // max(per_el, 1)) // 8 * 8)
        # never collapse to ~1 grid step (keep v7x's second TensorCore busy)
        half = _cdiv(B, 2)
        if bb > half:
            bb = max(8, _cdiv(half, 8) * 8)
        nb = max(2, _cdiv(B, bb))
        # rebalance so padding is minimal; align to 128 for unmasked stores
        align = 128 if bb >= 128 else 8
        bb = max(align, _cdiv(_cdiv(B, nb), align) * align)
        block_b = bb
    n_blocks = max(2, _cdiv(B, block_b))
    Bp = n_blocks * block_b

    # Lane-dense output layout only pays off when the natural last dims are
    # narrower than a lane (<128) and the batch block is wide enough.
    lane_dense = (block_b >= 128) and (min(H, S) < 128)

    hs = hidden_states
    if Bp != B:  # zero padding is safe: padded rows -> uniform attn, out = 0
        pad = Bp - B
        hs = jnp.pad(hs, ((0, pad), (0, 0), (0, 0)))
        bias = jnp.pad(bias, ((0, pad), (0, 0)))

    # ---- explicit scoped-VMEM limit (per-chip retune) ------------------------
    est = (2 * block_b * S * H * isz            # hidden, double-buffered
           + 2 * block_b * A * 4                # fused bias
           + 2 * (H * A * isz + A * 4)          # weights (conservative)
           + 2 * block_b * (H * isz + S * 4))   # outputs
    vmem_limit = int(min(int(cap * 0.9), max(2 * est + (8 << 20), 32 << 20)))

    if lane_dense:
        out_shape = (jax.ShapeDtypeStruct((H, Bp), in_dtype),
                     jax.ShapeDtypeStruct((S, Bp), jnp.float32))
        out_specs = [pl.BlockSpec((H, block_b), lambda b: (0, b)),
                     pl.BlockSpec((S, block_b), lambda b: (0, b))]
    else:
        out_shape = (jax.ShapeDtypeStruct((Bp, H), in_dtype),
                     jax.ShapeDtypeStruct((Bp, S), jnp.float32))
        out_specs = [pl.BlockSpec((block_b, H), lambda b: (b, 0)),
                     pl.BlockSpec((block_b, S), lambda b: (b, 0))]

    kernel = functools.partial(_x2_attn_kernel, lane_dense_out=lane_dense)

    out, attn = pl.pallas_call(
        kernel,
        out_shape=out_shape,
        grid_spec=pltpu.PrefetchScalarGridSpec(
            num_scalar_prefetch=0,
            grid=(n_blocks,),
            in_specs=[
                pl.BlockSpec((block_b, S, H), lambda b: (b, 0, 0)),  # hidden
                pl.BlockSpec((block_b, A), lambda b: (b, 0)),        # fused bias
                pl.BlockSpec((H, A), lambda b: (0, 0)),              # Wh^T
                pl.BlockSpec((1, A), lambda b: (0, 0)),              # V row
            ],
            out_specs=out_specs,
        ),
        compiler_params=pltpu.CompilerParams(
            dimension_semantics=("parallel",),
            vmem_limit_bytes=vmem_limit,
        ),
    )(hs, bias, whT, v_row)

    if lane_dense:
        out = out.T
        attn = attn.T
    if Bp != B:
        out = out[:B]
        attn = attn[:B]
    return out, attn


def _reference(hidden_states, x0, x1, wh, bh, w0, w1, v):
    Ah = jnp.einsum("bsh,ah->bsa", hidden_states, wh) + bh
    A0 = jnp.einsum("bh,ah->ba", x0, w0)[:, None, :]
    A1 = jnp.einsum("bh,ah->ba", x1, w1)[:, None, :]
    w = jax.nn.relu(Ah + A0 + A1)
    scores = jnp.einsum("bsa,oa->bso", w, v)[..., 0]
    attn = jax.nn.softmax(scores, axis=1)
    out = jnp.einsum("bs,bsh->bh", attn, hidden_states)
    return out, attn


def _make_params(key, hidden_size, x0_hidden_size, x1_hidden_size, attention_size):
    ks = jax.random.split(key, 4)
    w_bound = float(np.sqrt(6.0 / (hidden_size + attention_size)))
    w0_bound = float(np.sqrt(6.0 / (x0_hidden_size + attention_size)))
    w1_bound = float(np.sqrt(6.0 / (x1_hidden_size + attention_size)))
    wh = jax.random.uniform(ks[0], (attention_size, hidden_size),
                            jnp.float32, -w_bound, w_bound)
    bh = jnp.zeros((attention_size,), jnp.float32)
    w0 = jax.random.uniform(ks[1], (attention_size, x0_hidden_size),
                            jnp.float32, -w0_bound, w0_bound)
    w1 = jax.random.uniform(ks[2], (attention_size, x1_hidden_size),
                            jnp.float32, -w1_bound, w1_bound)
    v = 0.1 * jax.random.normal(ks[3], (1, attention_size), jnp.float32)
    return wh, bh, w0, w1, v


def _run_case(key, B, S, hidden_size, x0_hidden_size, x1_hidden_size,
              attention_size, block_b=None):
    kp, kh, k0, k1 = jax.random.split(key, 4)
    wh, bh, w0, w1, v = _make_params(kp, hidden_size, x0_hidden_size,
                                     x1_hidden_size, attention_size)
    hidden_states = jax.random.normal(kh, (B, S, hidden_size), jnp.float32)
    x0 = jax.random.normal(k0, (B, x0_hidden_size), jnp.float32)
    x1 = jax.random.normal(k1, (B, x1_hidden_size), jnp.float32)

    out, attn = x2_self_attention(hidden_states, x0, x1, wh, bh, w0, w1, v,
                                  block_b=block_b)
    out = jax.block_until_ready(out)
    attn = jax.block_until_ready(attn)

    ref_out, ref_attn = _reference(hidden_states, x0, x1, wh, bh, w0, w1, v)
    np.testing.assert_allclose(np.asarray(out), np.asarray(ref_out),
                               rtol=1e-5, atol=1e-5)
    np.testing.assert_allclose(np.asarray(attn), np.asarray(ref_attn),
                               rtol=1e-5, atol=1e-5)


if __name__ == "__main__":
    # small shapes implied by the module's forward signature
    hidden_size = 32
    x0_hidden_size = 16
    x1_hidden_size = 24
    attention_size = 64

    key = jax.random.PRNGKey(0)
    k_small, k_large = jax.random.split(key, 2)

    # Case 1: tiny batch -> batch-major stores, padded to 2 grid steps.
    _run_case(k_small, B=2, S=8,
              hidden_size=hidden_size, x0_hidden_size=x0_hidden_size,
              x1_hidden_size=x1_hidden_size, attention_size=attention_size)

    # Case 2: larger batch with an explicit 128-wide batch block -> exercises
    # the lane-dense (transposed) output path.
    _run_case(k_large, B=200, S=8,
              hidden_size=hidden_size, x0_hidden_size=x0_hidden_size,
              x1_hidden_size=x1_hidden_size, attention_size=attention_size,
              block_b=128)

    # dropout with attention_probs_dropout_prob=0.0 is the identity (eval mode)
    print("KERNEL_OK")
</pallas_src>

<mosaic_0001>
module attributes {stable_mosaic.version = 11 : i64} {
  func.func @_x2_attn_kernel(%arg0: i32, %arg1: memref<8x8x32xf32, #tpu.memory_space<vmem>>, %arg2: memref<8x64xf32, #tpu.memory_space<vmem>>, %arg3: memref<32x64xf32, #tpu.memory_space<vmem>>, %arg4: memref<1x64xf32, #tpu.memory_space<vmem>>, %arg5: memref<8x32xf32, #tpu.memory_space<vmem>>, %arg6: memref<8x8xf32, #tpu.memory_space<vmem>>) attributes {dimension_semantics = [#tpu.dimension_semantics<parallel>], iteration_bounds = array<i64: 2>, scalar_prefetch = 0 : i64, scratch_operands = 0 : i64, tpu.core_type = #tpu.core_type<tc>, window_params = [{transform_indices = @transform_0, window_bounds = array<i64: 8, 8, 32>}, {transform_indices = @transform_1, window_bounds = array<i64: 8, 64>}, {pipeline_mode = #tpu.pipeline_mode<synchronous>, transform_indices = @transform_2, window_bounds = array<i64: 32, 64>}, {pipeline_mode = #tpu.pipeline_mode<synchronous>, transform_indices = @transform_3, window_bounds = array<i64: 1, 64>}, {transform_indices = @transform_4, window_bounds = array<i64: 8, 32>}, {transform_indices = @transform_5, window_bounds = array<i64: 8, 8>}]} {
    %c0 = arith.constant 0 : index
    %c0_0 = arith.constant 0 : index
    %c0_1 = arith.constant 0 : index
    %0 = vector.load %arg1[%c0, %c0_0, %c0_1] : memref<8x8x32xf32, #tpu.memory_space<vmem>>, vector<8x8x32xf32>
    %1 = vector.shape_cast %0 : vector<8x8x32xf32> to vector<64x32xf32>
    %c0_2 = arith.constant 0 : index
    %c0_3 = arith.constant 0 : index
    %2 = vector.load %arg3[%c0_2, %c0_3] : memref<32x64xf32, #tpu.memory_space<vmem>>, vector<32x64xf32>
    %cst = arith.constant dense<0.000000e+00> : vector<64x64xf32>
    %3 = tpu.matmul %1, %2, %cst {dimension_numbers = #tpu.dot_dimension_numbers<[1], [0], [0], [1], [0, 0, 1, 1], [], []>} : vector<64x32xf32>, vector<32x64xf32>, vector<64x64xf32> -> vector<64x64xf32>
    %4 = vector.shape_cast %3 : vector<64x64xf32> to vector<8x8x64xf32>
    %c0_4 = arith.constant 0 : index
    %c0_5 = arith.constant 0 : index
    %5 = vector.load %arg2[%c0_4, %c0_5] : memref<8x64xf32, #tpu.memory_space<vmem>>, vector<8x64xf32>
    %6 = vector.shape_cast %5 : vector<8x64xf32> to vector<8x1x64xf32>
    %7 = vector.broadcast %6 : vector<8x1x64xf32> to vector<8x8x64xf32>
    %8 = arith.addf %4, %7 : vector<8x8x64xf32>
    %cst_6 = arith.constant 0.000000e+00 : f32
    %9 = vector.broadcast %cst_6 : f32 to vector<8x8x64xf32>
    %10 = arith.maximumf %8, %9 : vector<8x8x64xf32>
    %c0_7 = arith.constant 0 : index
    %c0_8 = arith.constant 0 : index
    %11 = vector.load %arg4[%c0_7, %c0_8] : memref<1x64xf32, #tpu.memory_space<vmem>>, vector<1x64xf32>
    %12 = vector.shape_cast %11 : vector<1x64xf32> to vector<1x1x64xf32>
    %13 = vector.broadcast %12 : vector<1x1x64xf32> to vector<8x8x64xf32>
    %14 = arith.mulf %10, %13 : vector<8x8x64xf32>
    %cst_9 = arith.constant dense<0.000000e+00> : vector<8x8xf32>
    %15 = vector.multi_reduction <add>, %14, %cst_9 [2] : vector<8x8x64xf32> to vector<8x8xf32>
    %cst_10 = arith.constant dense<0xFF800000> : vector<8xf32>
    %16 = vector.multi_reduction <maximumf>, %15, %cst_10 [1] : vector<8x8xf32> to vector<8xf32>
    %17 = vector.shape_cast %16 : vector<8xf32> to vector<8x1xf32>
    %18 = vector.broadcast %17 : vector<8x1xf32> to vector<8x8xf32>
    %19 = arith.subf %15, %18 : vector<8x8xf32>
    %20 = math.exp %19 : vector<8x8xf32>
    %cst_11 = arith.constant dense<0.000000e+00> : vector<8xf32>
    %21 = vector.multi_reduction <add>, %20, %cst_11 [1] : vector<8x8xf32> to vector<8xf32>
    %22 = vector.shape_cast %21 : vector<8xf32> to vector<8x1xf32>
    %23 = tpu.reciprocal %22 : vector<8x1xf32> -> vector<8x1xf32>
    %24 = vector.broadcast %23 : vector<8x1xf32> to vector<8x8xf32>
    %25 = arith.mulf %20, %24 : vector<8x8xf32>
    %c0_12 = arith.constant 0 : index
    %c0_13 = arith.constant 0 : index
    %c0_14 = arith.constant 0 : index
    %26 = vector.load %arg1[%c0_12, %c0_13, %c0_14] : memref<8x8x32xf32, #tpu.memory_space<vmem>>, vector<8x8x32xf32>
    %27 = vector.shape_cast %25 : vector<8x8xf32> to vector<8x8x1xf32>
    %28 = vector.broadcast %27 : vector<8x8x1xf32> to vector<8x8x32xf32>
    %29 = arith.mulf %28, %26 : vector<8x8x32xf32>
    %cst_15 = arith.constant dense<0.000000e+00> : vector<8x32xf32>
    %30 = vector.multi_reduction <add>, %29, %cst_15 [1] : vector<8x8x32xf32> to vector<8x32xf32>
    %c0_16 = arith.constant 0 : index
    %c0_17 = arith.constant 0 : index
    %31 = vector.load %arg6[%c0_16, %c0_17] : memref<8x8xf32, #tpu.memory_space<vmem>>, vector<8x8xf32>
    tpu.vector_store %arg6[%c0_16, %c0_17], %25 {strides = array<i32>} : memref<8x8xf32, #tpu.memory_space<vmem>>, vector<8x8xf32>,
    %c0_18 = arith.constant 0 : index
    %c0_19 = arith.constant 0 : index
    %32 = vector.load %arg5[%c0_18, %c0_19] : memref<8x32xf32, #tpu.memory_space<vmem>>, vector<8x32xf32>
    tpu.vector_store %arg5[%c0_18, %c0_19], %30 {strides = array<i32>} : memref<8x32xf32, #tpu.memory_space<vmem>>, vector<8x32xf32>,
    return
  }
  func.func @transform_0(%arg0: i32) -> (i32, i32, i32) {
    %c0_i32 = arith.constant 0 : i32
    %c0_i32_0 = arith.constant 0 : i32
    %c0_i32_1 = arith.constant 0 : i32
    return %arg0, %c0_i32, %c0_i32_0 : i32, i32, i32
  }
  func.func @transform_1(%arg0: i32) -> (i32, i32) {
    %c0_i32 = arith.constant 0 : i32
    %c0_i32_0 = arith.constant 0 : i32
    return %arg0, %c0_i32 : i32, i32
  }
  func.func @transform_2(%arg0: i32) -> (i32, i32) {
    %c0_i32 = arith.constant 0 : i32
    %c0_i32_0 = arith.constant 0 : i32
    %c0_i32_1 = arith.constant 0 : i32
    return %c0_i32, %c0_i32_0 : i32, i32
  }
  func.func @transform_3(%arg0: i32) -> (i32, i32) {
    %c0_i32 = arith.constant 0 : i32
    %c0_i32_0 = arith.constant 0 : i32
    %c0_i32_1 = arith.constant 0 : i32
    return %c0_i32, %c0_i32_0 : i32, i32
  }
  func.func @transform_4(%arg0: i32) -> (i32, i32) {
    %c0_i32 = arith.constant 0 : i32
    %c0_i32_0 = arith.constant 0 : i32
    return %arg0, %c0_i32 : i32, i32
  }
  func.func @transform_5(%arg0: i32) -> (i32, i32) {
    %c0_i32 = arith.constant 0 : i32
    %c0_i32_0 = arith.constant 0 : i32
    return %arg0, %c0_i32 : i32, i32
  }
}

</mosaic_0001>

<bundles_post_ra>
// kernel: tpu_custom_call.1
= control target key start
LH: loop header
LB: loop body
LE: loop exit
PB: predicated region body
PF: predicated region fallthrough
CT: control target
= control target key end

     0   :  { %s1919_s0 = inlined_call_operand.hbm [shape: f32[16,8,32], index: 0, kind: input, shape index: {}]   ;;  %s1920_s1 = inlined_call_operand.hbm [shape: f32[16,64], index: 1, kind: input, shape index: {}]   ;;  %s1921_s2 = inlined_call_operand.hbm [shape: f32[32,64], index: 2, kind: input, shape index: {}]   ;;  %s1922_s3 = inlined_call_operand.vmem [shape: f32[1,64], index: 3, kind: input, shape index: {}]   ;;  %s1923_s4 = inlined_call_operand.hbm [shape: f32[16,32], index: 4, kind: output, shape index: {0}]   ;;  %s1924_s5 = inlined_call_operand.vmem [shape: f32[16,8], index: 5, kind: output, shape index: {1}]  }
   0x1   :  { %1929 = sst [smem:[#allocation14_spill]] %s1919_s0 }
   0x2   :  { %1930 = sst [smem:[#allocation15_spill]] %s1921_s2 }
   0x3   :  { %11 = vsyncpa [#allocation3], 0 }
   0x4   :  { %13 = vsyncpa [#allocation3 + $0x1], 0 }
   0x5   :  { %14 = vsyncpa [#allocation6], 0 }
   0x6   :  { %16 = vsyncpa [#allocation6 + $0x1], 0 }
   0x7   :  { %17 = vsyncpa [#allocation4], 0 }
   0x8   :  { %19 = vsyncpa [#allocation4 + $0x1], 0  ;;  %s1505_s18 = smov 0   ;;  %s1507_s19 = smov 0  }
   0x9   :  { %s1509_s20 = smov 0   ;;  %s1511_s21 = smov 0  }
   0xa LB: > { %s1526_s22 = sadd.s32 4294967295, %s1465_s21   ;;  %s1155_s23 = sadd.s32 4294967294, %s1465_s21   ;;  %s1465_s21 = sphi %s1511_s21, %s1954_s21   ;;  %s1461_s20 = sphi %s1509_s20, %s1953_s20   ;;  %s1457_s19 = sphi %s1507_s19, %s1952_s19   ;;  %s1453_s18 = sphi %s1505_s18, %s1951_s18  }
   0xb   : > { %p45_p0 = scmp.ne.s32.totalorder %s1457_s19, %s1453_s18  ;;  %p1925_p1 = scmp.eq.s32.totalorder %s1526_s22, 0 }
   0xc   : > { %p143_p3 = scmp.eq.s32.totalorder %s1155_s23, 1  ;;  %p1156_p5 = scmp.ge.s32.totalorder %s1465_s21, 1 }
   0xd   : > { %p1535_p4 = por %p1925_p1, %p45_p0  ;;  %p176_p7 = scmp.lt.s32.totalorder %s1465_s21, 3 }
   0xe   : > { %p1540_p6 = por %p143_p3, %p45_p0  ;;  %s1467_s27 = smov [#allocation7]  }
   0xf   : > { %s1931_s24 = scalar_select %p1535_p4, 1, 0 }
  0x10   : > { %s1932_s25 = scalar_select %p1540_p6, 1, 0 }
  0x11   : > { %p1545_p8 = pnand %p1156_p5, %p176_p7  ;;  %s188_s28 = sshll.u32 %s1467_s27, 4  ;;  %s189_s28 = int_to_ptr.vmem [resolvable:$true] %s188_s28 }
  0x12   : > { %s1559_s30 = sadd.s32 1, %s1465_s21   ;;  %s32_s6 = sadd.s32 1, %s1461_s20 }
  0x13   : > { %s1933_s26 = scalar_select %p1545_p8, 1, 0 }
  0x14   : > { %p1234_p9 = pneg %p1545_p8  ;;  %s29_s7 = ssub.s32 %s1465_s21, %s1559_s30 }
  0x15   : > { %s1322_s8 = scalar_lea.vmem %s189_s28, 512  ;;  %p1330_p5 = scmp.lt.s32.totalorder %s189_s28, %s189_s28 }
  0x16   : > { %p1554_p11 = pnand %p1234_p9, %p1925_p1  ;;  %p1323_p13 = scmp.ne.s32.totalorder %s189_s28, %s1322_s8 }
  0x17   : > { %p1331_p7 = scmp.lt.s32.totalorder %s1322_s8, %s1322_s8 }
  0x18   : > { %p1313_p12 = pneg %p1554_p11 }
  0x19   : > { %p1332_p10 = por %p1331_p7, %p1330_p5 }
  0x1a   : > { %p1325_p0 = pnand %p1323_p13, %p1313_p12 }
  0x1c   : > { %p1326_p3 = pneg %p1325_p0 }
  0x1e   : > { %p1333_p2 = pnand %p1332_p10, %p1326_p3 }
  0x20   : > { %1336 = shalt.err (!%p1333_p2)
}
  0x21   : > { %s1468_s9 = smov 128   ;;  %s1469_s10 = smov 8  }
  0x22   : > { %s1935_s2 = sld [smem:[#allocation15_spill]]  ;;  %p30_p2 = scmp.eq.s32.totalorder %s29_s7, 0 }
  0x23   : > { %p39_p9 = scmp.ne.s32.totalorder %s1461_s20, %s1457_s19  ;;  %p40_p10 = scmp.eq.s32.totalorder %s1465_s21, 0 }
  0x24   : > { %p1250_p12 = scmp.lt.s32.totalorder %s1465_s21, 2  ;;  %p1937_p0 = scmp.eq.s32.totalorder %s1526_s22, 1 }
  0x25   : > { %s1579_s13 = scalar_select %p30_p2, %s1461_s20, %s32_s6  }
  0x26   : > { %p41_p13 = por %p40_p10, %p39_p9  ;;  %p1583_p3 = por %p1937_p0, %p39_p9 }
  0x27   : > { %1936 = sst [smem:[#allocation13_spill]] %s1579_s13  ;;  %s1588_s15 = sand.u32 1, %s1461_s20  }
  0x28   : > { %1237 = dma.hbm_to_vmem [thread:$0]  (!%p1554_p11), %s1935_s2, 512, %s189_s28, [#allocation6], %s1468_s9, %s1468_s9, %s1469_s10  }
  0x29   : > { %s1938_s14 = scalar_select %p1583_p3, 1, 0 }
  0x2a   : > { %s1183_s16 = sshll.u32 %s1465_s21, 10  ;;  %s1159_s17 = sshll.u32 %s1588_s15, 6 }
  0x2b   : > { %s1939_s0 = sld [smem:[#allocation14_spill]]  ;;  %s209_s29 = scalar_lea.vmem [#allocation2], %s1159_s17 }
  0x2c   : > { %s216_s6 = sshll.u32 %s209_s29, 4  ;;  %p1597_p11 = pnand %p1250_p12, %p41_p13  ;;  %s1601_s6 = int_to_ptr.vmem [resolvable:$true] %s216_s6 }
  0x2e   : > { %p1339_p7 = pneg %p1597_p11 }
  0x31   : > { %s1595_s28 = scalar_lea.hbm %s1939_s0, %s1183_s16  ;;  %s1342_s23 = scalar_lea.hbm %s1939_s0, 2048 }
  0x32   : > { %s1337_s12 = scalar_lea.hbm %s1595_s28, 1024  ;;  %p1343_p10 = scmp.lt.s32.totalorder %s1595_s28, %s1939_s0 }
  0x33   : > { %p1338_p5 = scmp.ne.s32.totalorder %s1595_s28, %s1337_s12  ;;  %p1344_p12 = scmp.lt.s32.totalorder %s1342_s23, %s1337_s12 }
  0x35   : > { %p1340_p2 = pnand %p1339_p7, %p1338_p5  ;;  %p1345_p13 = por %p1344_p12, %p1343_p10 }
  0x37   : > { %p1341_p9 = pneg %p1340_p2 }
  0x39   : > { %p1346_p0 = pnand %p1345_p13, %p1341_p9 }
  0x3b   : > { %1349 = shalt.err (!%p1346_p0)
}
  0x3c   : > { %s1350_s8 = scalar_lea.vmem %s1601_s6, 1024  ;;  %s1470_s16 = smov [#allocation2]  }
  0x3d   : > { %p1351_p1 = scmp.ne.s32.totalorder %s1601_s6, %s1350_s8  ;;  %s1355_s17 = sshll.u32 %s1470_s16, 4  ;;  %s1356_s17 = int_to_ptr.vmem [resolvable:$false] %s1355_s17 }
  0x3e   : > { %s1357_s11 = scalar_lea.vmem %s1356_s17, 2048  ;;  %p1358_p6 = scmp.lt.s32.totalorder %s1601_s6, %s1356_s17 }
  0x3f   : > { %p1353_p5 = pnand %p1351_p1, %p1339_p7  ;;  %p1359_p3 = scmp.lt.s32.totalorder %s1357_s11, %s1350_s8 }
  0x41   : > { %p1354_p2 = pneg %p1353_p5  ;;  %p1360_p4 = por %p1359_p3, %p1358_p6 }
  0x43   : > { %p1361_p10 = pnand %p1360_p4, %p1354_p2 }
  0x45   : > { %1364 = shalt.err (!%p1361_p10)
}
  0x46   : > { %s1941_s12 = scalar_lea.sflag [#allocation3], %s1588_s15  ;;  %s1162_s23 = sshll.u32 %s1588_s15, 3 }
  0x47   : > { %1241 = dma.hbm_to_vmem [thread:$0]  (!%p1597_p11), %s1595_s28, 1024, %s1601_s6, %s1941_s12, %s1468_s9, %s1468_s9, %s1469_s10  }
  0x48   : > { %s1163_s27 = sshll.u32 %s1465_s21, 7  ;;  %s230_s16 = scalar_lea.vmem [#allocation5], %s1162_s23 }
  0x49   : > { %s1639_s29 = scalar_lea.hbm %s1920_s1, %s1163_s27  ;;  %s237_s17 = sshll.u32 %s230_s16, 4  ;;  %s238_s17 = int_to_ptr.vmem [resolvable:$true] %s237_s17 }
  0x4a   : > { %s1942_s0 = sand.u32 1, %s1465_s21   ;;  %s1365_s13 = scalar_lea.hbm %s1639_s29, 128 }
  0x4b   : > { %s227_s2 = scalar_lea.sflag [#allocation6], %s1942_s0  ;;  %p1366_p1 = scmp.ne.s32.totalorder %s1639_s29, %s1365_s13 }
  0x4c   : > { %s1370_s15 = scalar_lea.hbm %s1920_s1, 256  ;;  %p1371_p3 = scmp.lt.s32.totalorder %s1639_s29, %s1920_s1 }
  0x4d   : > { %p1368_p4 = pnand %p1366_p1, %p1339_p7  ;;  %p1372_p9 = scmp.lt.s32.totalorder %s1370_s15, %s1365_s13 }
  0x4f   : > { %p1369_p6 = pneg %p1368_p4  ;;  %p1373_p12 = por %p1372_p9, %p1371_p3 }
  0x51   : > { %p1374_p13 = pnand %p1373_p12, %p1369_p6 }
  0x53   : > { %1377 = shalt.err (!%p1374_p13)
}
  0x54   : > { %s1378_s12 = scalar_lea.vmem %s238_s17, 128  ;;  %s1471_s0 = smov [#allocation5]  }
  0x55   : > { %p1379_p0 = scmp.ne.s32.totalorder %s238_s17, %s1378_s12  ;;  %s1383_s23 = sshll.u32 %s1471_s0, 4  ;;  %s1384_s23 = int_to_ptr.vmem [resolvable:$false] %s1383_s23 }
  0x56   : > { %s1385_s27 = scalar_lea.vmem %s1384_s23, 256  ;;  %p1386_p10 = scmp.lt.s32.totalorder %s238_s17, %s1384_s23 }
  0x57   : > { %p1381_p5 = pnand %p1379_p0, %p1339_p7  ;;  %p1387_p1 = scmp.lt.s32.totalorder %s1385_s27, %s1378_s12 }
  0x59   : > { %p1382_p2 = pneg %p1381_p5  ;;  %p1388_p4 = por %p1387_p1, %p1386_p10 }
  0x5b   : > { %p1389_p8 = pnand %p1388_p4, %p1382_p2 }
  0x5d   : > { %1392 = shalt.err (!%p1389_p8)
}
  0x5e   : > { %1244 = dma.hbm_to_vmem [thread:$0]  (!%p1597_p11), %s1639_s29, 128, %s238_s17, %s227_s2  }
  0x5f   : > { %p1943_p6 = scmp.ne.s32.totalorder %s1933_s26, 0 }
  0x60   : > { %s1664_s13 = sand.u32 (!%p1943_p6), 1, %s1457_s19   ;;  %p1944_p7 = scmp.ne.s32.totalorder (!%p1943_p6), %s1931_s24, 0 }
  0x61   : > { %246 = sbr.rel (%p1943_p6) target bundleno = 1123 (0x463), region = 36  ;;  %s1165_s8 = sshll.u32 (!%p1943_p6), %s1664_s13, 6 }
  0x62   : > { %s249_s11 = scalar_lea.sflag (!%p1943_p6), [#allocation3], %s1664_s13  ;;  %s1668_s16 = scalar_lea.vmem (!%p1943_p6), [#allocation2], %s1165_s8 }
  0x66   : > { %1436 = dma.done.wait (%p1944_p7), %s249_s11, 1024  }
  0x67   : > { %1438 = vsyncadd (%p1944_p7), %s249_s11, 4294966272  ;;  %s257_s2 = sand.u32 1, %s1526_s22   ;;  %s1166_s26 = sshll.u32 %s1664_s13, 3 }
  0x68   : > { %s258_s7 = scalar_lea.sflag [#allocation6], %s257_s2  ;;  %s1678_s29 = scalar_lea.vmem [#allocation5], %s1166_s26 }
  0x69   : > { %1440 = dma.done.wait (%p1944_p7), %s258_s7, 128  }
  0x6a   : > { %1442 = vsyncadd (%p1944_p7), %s258_s7, 4294967168  ;;  %p1945_p8 = scmp.eq.s32.totalorder %s1526_s22, 0 }
  0x6c   : > { %1444 = dma.done.wait (%p1945_p8), [#allocation6], 512   ;;  %p1946_p11 = pmov %p1945_p8 }
  0x6d   : > { %vm318_vm0 = vcmask 261120   ;;  %v317_v0 = vld [vmem:[#allocation7 + $0x18] sm:$0xff]  ;;  %v316_v1 = vld [vmem:[#allocation7 + $0x10] sm:$0xff]  ;;  %v315_v3 = vld [vmem:[#allocation7 + $0x8] sm:$0xff]  ;;  %v1472_v12 = vmov 1966171168   ;;  %v454_v14 = vlaneseq }
  0x6e   : > { %1446 = vsyncadd (%p1946_p11), [#allocation6], 4294966784  ;;  %1196 = vmatprep.subr.mxu0 %v317_v0  ;;  %1216 = vmatprep.subr.mxu1 %v317_v0  ;;  %v1689_v2 = vld [vmem:[%s1668_s16] sm:$0xff]  ;;  %v314_v4 = vld [vmem:[#allocation7] sm:$0xff]  ;;  %v452_v13 = vunpack.c.l.s4 %v1472_v12  ;;  %vm570_vm1 = vcmask 523264   ;;  %vm637_vm2 = vcmask 1041409  }
  0x6f   : > { %1197 = vmatpush3.msra.mxu0 %v317_v0  ;;  %1204 = vmatprep.mubr.msk.f32.mxu0 %vm318_vm0, %v1689_v2  ;;  %v1694_v5 = vld [vmem:[%s1668_s16 + $0x8] sm:$0xff]  ;;  %v1697_v6 = vld [vmem:[%s1668_s16 + $0x10] sm:$0xff]  ;;  %v1700_v7 = vld [vmem:[%s1668_s16 + $0x20] sm:$0xff]  ;;  %v1729_v16 = vshrl.u32 %v454_v14, 7  ;;  %vm639_vm3 = vcmask 1042434   ;;  %vm641_vm4 = vcmask 1043459  }
  0x70   : > { %1198 = vmatprep.subr.mxu0 %v316_v1  ;;  %1220 = vmatpush3.msra.mxu1 %v317_v0  ;;  %v1703_v8 = vld [vmem:[%s1668_s16 + $0x28] sm:$0xff]  ;;  %v1708_v9 = vld [vmem:[%s1668_s16 + $0x30] sm:$0xff]  ;;  %v1713_v10 = vld [vmem:[%s1668_s16 + $0x18] sm:$0xff]  ;;  %v453_v15 = vunpack.c.0.s8 %v452_v13  ;;  %vm643_vm5 = vcmask 1044484   ;;  %vm645_vm6 = vcmask 1045509   ;;  %vm647_vm7 = vcmask 1046534  }
  0x71   : > { %1199 = vmatpush3.msra.mxu0 %v316_v1  ;;  %1217 = vmatprep.subr.mxu1 %v316_v1  ;;  %v1722_v11 = vld [vmem:[%s1668_s16 + $0x38] sm:$0xff]  ;;  %v448_v18 = vld [vmem:[%s1678_s29] sm:$0xff]  ;;  %v1734_v24 = vsub.s32 0, %v1729_v16  ;;  %vm649_vm8 = vcmask 1047559   ;;  %vm652_vm9 = vcmask 64512   ;;  %p302_p3 = scmp.lt.s32.totalorder %s1526_s22, 1 }
  0x72   : > { %1200 = vmatprep.subr.mxu0 %v315_v3  ;;  %1221 = vmatpush3.msra.mxu1 %v316_v1  ;;  %v456_v17 = vsub.s32 %v453_v15, %v1729_v16  ;;  %v450_v20 = vcombine.high %v448_v18, %v448_v18  ;;  %v1178_v40 = vld [vmem:[%s1922_s3] ss:$0 sm:$0xff]  ;;  %s1180_s12 = sshll.u32 %s1526_s22, 7  ;;  %s294_s0 = scalar_lea.vmem [#allocation8], %s1166_s26 }
  0x73   : > { %1201 = vmatpush3.msra.mxu0 %v315_v3  ;;  %1218 = vmatprep.subr.mxu1 %v315_v3  ;;  %s1844_s9 = scalar_select %p302_p3, %s1526_s22, 1 }
  0x74   : > { %1202 = vmatprep.subr.mxu0 %v314_v4  ;;  %1222 = vmatpush3.msra.mxu1 %v315_v3  ;;  %v457_v19 = vrot.slane %v448_v18, %v456_v17  ;;  %v464_v22 = vrot.slane %v450_v20, %v456_v17  ;;  %s1026_s23 = sshll.u32 %s294_s0, 4  ;;  %s1880_s11 = scalar_lea.hbm %s1923_s4, %s1180_s12  ;;  %s1027_s23 = int_to_ptr.vmem [resolvable:$true] %s1026_s23 }
  0x75   : > { %1203 = vmatpush3.msra.mxu0 %v314_v4  ;;  %1219 = vmatprep.subr.mxu1 %v314_v4  ;;  %s1169_s10 = sshll.u32 %s1844_s9, 3  ;;  %s1009_s22 = scalar_lea.sflag [#allocation4], %s1664_s13 }
  0x76   : > { %1205 = vmatmul.mubr.msk.f32.vlgmr.msra.gmra.mxu0 %vm318_vm0, %v1694_v5  ;;  %1223 = vmatpush3.msra.mxu1 %v314_v4  ;;  %v465_v21 = vcombine.high %v457_v19, %v457_v19  ;;  %v466_v25 = vcombine.high %v464_v22, %v464_v22  ;;  %v473_v26 = vrot.slane %v457_v19, %v456_v17  ;;  %s305_s6 = scalar_lea.vmem %s1924_s5, %s1169_s10  ;;  %s1393_s16 = scalar_lea.vmem %s1027_s23, 128 }
  0x77   : > { %1207 = vmatprep.mubr.msk.f32.mxu0 %vm318_vm0, %v1697_v6  ;;  %1210 = vmatprep.mubr.msk.f32.mxu1 %vm318_vm0, %v1700_v7  ;;  %v480_v30 = vrot.slane %v464_v22, %v456_v17  ;;  %p1394_p9 = scmp.ne.s32.totalorder %s1027_s23, %s1393_s16  ;;  %p1947_p12 = scmp.ne.s32.totalorder %s1938_s14, 0 }
  0x78   : > { %1211 = vmatmul.mubr.msk.f32.vlgmr.msra.gmra.mxu1 %vm318_vm0, %v1703_v8  ;;  %v487_v23 = vrot.slane %v465_v21, %v456_v17  ;;  %v494_v29 = vrot.slane %v466_v25, %v456_v17  ;;  %v502_v31 = vrot.slane %v473_v26, %v1734_v24  ;;  %v495_v32 = vcombine.high %v473_v26, %v473_v26  ;;  %s1474_s2 = smov [#allocation8]  }
  0x79   : > { %1213 = vmatprep.mubr.msk.f32.mxu1 %vm318_vm0, %v1708_v9  ;;  %v496_v36 = vcombine.high %v480_v30, %v480_v30  ;;  %v518_v41 = vrot.slane %v480_v30, %v1734_v24  ;;  %p1395_p13 = pnand %p1394_p9, %p1947_p12  ;;  %s1397_s26 = sshll.u32 %s1474_s2, 4  ;;  %s1398_s26 = int_to_ptr.vmem [resolvable:$false] %s1397_s26 }
  0x7a   : > { %1208 = vmatmul.mubr.msk.f32.gmra.mxu0 %vm318_vm0, %v1713_v10  ;;  %v506_v27 = vrot.slane %v487_v23, %v1734_v24  ;;  %v497_v28 = vcombine.high %v487_v23, %v487_v23  ;;  %v522_v39 = vrot.slane %v494_v29, %v1734_v24  ;;  %v498_v42 = vcombine.high %v494_v29, %v494_v29  ;;  %s1399_s7 = scalar_lea.vmem %s1398_s26, 256  ;;  %p1400_p5 = scmp.lt.s32.totalorder %s1027_s23, %s1398_s26 }
  0x7b   : > { %v510_v45 = vrot.slane %v495_v32, %v1734_v24  ;;  %v526_v51 = vrot.slane %v496_v36, %v1734_v24  ;;  %v604_v29 = vand.u32 127, %v454_v14  ;;  %p1396_p0 = pneg %p1395_p13  ;;  %p1401_p2 = scmp.lt.s32.totalorder %s1399_s7, %s1393_s16 }
  0x7c   : > { %1214 = vmatmul.mubr.msk.f32.gmra.mxu1 %vm318_vm0, %v1722_v11  ;;  %v514_v35 = vrot.slane %v497_v28, %v1734_v24  ;;  %v530_v56 = vrot.slane %v498_v42, %v1734_v24 }
  0x7d   : > { %p1402_p10 = por %p1401_p2, %p1400_p5 }
  0x7f   : > { %p1403_p1 = pnand %p1402_p10, %p1396_p0 }
 0x136   : > { %v1206_v33 = vpop.f32.mrf.mxu0 }
 0x137   : > { %v540_v34 = vadd.f32 %v1206_v33, %v506_v27 }
 0x138   : > { %v409_v37 = vpop.f32.mrf.mxu0  ;;  %v1212_v38 = vpop.f32.mrf.mxu1 }
 0x139   : > { %v548_v43 = vmax.f32 %v540_v34, 0.0  ;;  %v539_v44 = vadd.f32 %v502_v31, %v409_v37  ;;  %v544_v53 = vadd.f32 %v1212_v38, %v522_v39  ;;  %v1757_v31 = vsub.s32 %v604_v29, %v1729_v16 }
 0x13a   : > { %v1209_v46 = vpop.f32.mrf.mxu0  ;;  %v429_v47 = vpop.f32.mrf.mxu1 }
 0x13b   : > { %v547_v48 = vmax.f32 %v539_v44, 0.0  ;;  %v542_v49 = vadd.f32 %v1209_v46, %v514_v35  ;;  %v563_v50 = vmul.f32 %v1178_v40, %v548_v43  ;;  %v543_v54 = vadd.f32 %v518_v41, %v429_v47 }
 0x13c   : > { %v419_v52 = vpop.f32.mrf.mxu0  ;;  %v1215_v55 = vpop.f32.mrf.mxu1  ;;  %v552_v3 = vmax.f32 %v544_v53, 0.0 }
 0x13d   : > { %v550_v57 = vmax.f32 %v542_v49, 0.0  ;;  %v541_v58 = vadd.f32 %v510_v45, %v419_v52  ;;  %v574_v59 = vsel %vm570_vm1, %v563_v50, 0.0  ;;  %v551_v60 = vmax.f32 %v543_v54, 0.0 }
 0x13e   : > { %575 = vadd.xlane.f32.xlu0 %v574_v59  ;;  %v562_v61 = vmul.f32 %v1178_v40, %v547_v48  ;;  %v439_v62 = vpop.f32.mrf.mxu1  ;;  %v546_v4 = vadd.f32 %v1215_v55, %v530_v56  ;;  %v567_v23 = vmul.f32 %v1178_v40, %v552_v3  ;;  %v1473_v54 = vmov 0  }
 0x13f   : > { %v549_v63 = vmax.f32 %v541_v58, 0.0  ;;  %v565_v0 = vmul.f32 %v1178_v40, %v550_v57  ;;  %v545_v1 = vadd.f32 %v526_v51, %v439_v62  ;;  %v566_v12 = vmul.f32 %v1178_v40, %v551_v60  ;;  %1291 = vset.pattern.permute.xlu0 %v1473_v54  ;;  %1290 = vset.pattern.permute.xlu1 %v1473_v54 }
 0x140   : > { %v571_v13 = vsel %vm570_vm1, %v562_v61, 0.0  ;;  %v554_v21 = vmax.f32 %v546_v4, 0.0  ;;  %v586_v26 = vsel %vm570_vm1, %v567_v23, 0.0  ;;  %v663_v55 = vsub.s32 1, %v1729_v16 }
 0x141   : > { %v580_v15 = vsel %vm570_vm1, %v565_v0, 0.0  ;;  %v553_v17 = vmax.f32 %v545_v1, 0.0  ;;  %v564_v18 = vmul.f32 %v1178_v40, %v549_v63  ;;  %v583_v19 = vsel %vm570_vm1, %v566_v12, 0.0 }
 0x142   : > { %572 = vadd.xlane.f32.xlu0 %v571_v13  ;;  %581 = vadd.xlane.f32.xlu1 %v580_v15  ;;  %v569_v27 = vmul.f32 %v1178_v40, %v554_v21  ;;  %v667_v56 = vsub.s32 2, %v1729_v16  ;;  %v671_v57 = vsub.s32 3, %v1729_v16  ;;  %v675_v62 = vsub.s32 4, %v1729_v16 }
 0x143   : > { %v568_v20 = vmul.f32 %v1178_v40, %v553_v17  ;;  %v577_v22 = vsel %vm570_vm1, %v564_v18, 0.0  ;;  %v679_v13 = vsub.s32 5, %v1729_v16  ;;  %v687_v23 = vsub.s32 7, %v1729_v16 }
 0x144   : > { %v592_v28 = vsel %vm570_vm1, %v569_v27, 0.0 }
 0x145   : > { %v589_v25 = vsel %vm570_vm1, %v568_v20, 0.0 }
 0x146   : > { %578 = vadd.xlane.f32.xlu1 %v577_v22  ;;  %584 = vadd.xlane.f32.xlu0 %v583_v19  ;;  %v683_v19 = vsub.s32 6, %v1729_v16 }
 0x14a   : > { %587 = vadd.xlane.f32.xlu1 %v586_v26  ;;  %590 = vadd.xlane.f32.xlu0 %v589_v25 }
 0x14e   : > { %593 = vadd.xlane.f32.xlu1 %v592_v28 }
 0x1c7   : > { %v576_v30 = vpop.xlane.xlu0 %575 }
 0x1c8   : > { %v612_v35 = vrot.slane %v576_v30, %v1757_v31 }
 0x1cb   : > { %v573_v32 = vpop.xlane.xlu0 %572  ;;  %v582_v33 = vpop.xlane.xlu1 %581 }
 0x1cc   : > { %v608_v34 = vrot.slane %v573_v32, %v1757_v31  ;;  %v620_v40 = vrot.slane %v582_v33, %v1757_v31 }
 0x1ce   : > { %v638_v14 = vsel %vm637_vm2, %v612_v35, %v608_v34 }
 0x1cf   : > { %v579_v36 = vpop.xlane.xlu1 %578  ;;  %v585_v37 = vpop.xlane.xlu0 %584 }
 0x1d0   : > { %v616_v38 = vrot.slane %v579_v36, %v1757_v31  ;;  %v624_v39 = vrot.slane %v585_v37, %v1757_v31 }
 0x1d2   : > { %v640_v41 = vsel %vm639_vm3, %v616_v38, %v638_v14 }
 0x1d3   : > { %v642_v42 = vsel %vm641_vm4, %v620_v40, %v640_v41  ;;  %v588_v43 = vpop.xlane.xlu1 %587  ;;  %v591_v44 = vpop.xlane.xlu0 %590 }
 0x1d4   : > { %v644_v45 = vsel %vm643_vm5, %v624_v39, %v642_v42  ;;  %v628_v46 = vrot.slane %v588_v43, %v1757_v31  ;;  %v632_v47 = vrot.slane %v591_v44, %v1757_v31 }
 0x1d6   : > { %v646_v48 = vsel %vm645_vm6, %v628_v46, %v644_v45 }
 0x1d7   : > { %v594_v49 = vpop.xlane.xlu1 %593  ;;  %v648_v51 = vsel %vm647_vm7, %v632_v47, %v646_v48 }
 0x1d8   : > { %v636_v50 = vrot.slane %v594_v49, %v1757_v31 }
 0x1da   : > { %v650_v52 = vsel %vm649_vm8, %v636_v50, %v648_v51 }
 0x1db   : > { %v653_v53 = vsel %vm652_vm9, %v650_v52, -inf }
 0x1dc   : > { %654 = vmax.xlane.f32.xlu0 %v653_v53 }
 0x265   : > { %v655_v58 = vpop.xlane.xlu0 %654 }
 0x266   : > { %v660_v59 = vrot.slane %v655_v58, %v1734_v24  ;;  %v664_v60 = vrot.slane %v655_v58, %v663_v55  ;;  %v668_v61 = vrot.slane %v655_v58, %v667_v56  ;;  %v672_v63 = vrot.slane %v655_v58, %v671_v57 }
 0x267   : > { %v676_v15 = vrot.slane %v655_v58, %v675_v62  ;;  %v680_v20 = vrot.slane %v655_v58, %v679_v13  ;;  %v684_v25 = vrot.slane %v655_v58, %v683_v19  ;;  %v688_v28 = vrot.slane %v655_v58, %v687_v23 }
 0x268   : > { %v697_v0 = vsub.f32 %v573_v32, %v660_v59  ;;  %v698_v1 = vsub.f32 %v576_v30, %v664_v60  ;;  %v699_v3 = vsub.f32 %v579_v36, %v668_v61  ;;  %v700_v17 = vsub.f32 %v582_v33, %v672_v63 }
 0x269   : > { %v701_v21 = vsub.f32 %v585_v37, %v676_v15  ;;  %v702_v26 = vsub.f32 %v588_v43, %v680_v20  ;;  %v703_v29 = vsub.f32 %v591_v44, %v684_v25  ;;  %v704_v34 = vsub.f32 %v594_v49, %v688_v28 }
 0x26a   : > { %v705_v4 = vmul.f32 1.442695, %v697_v0  ;;  %v707_v12 = vmul.f32 1.442695, %v698_v1  ;;  %v709_v18 = vmul.f32 1.442695, %v699_v3 }
 0x26b   : > { %v711_v22 = vmul.f32 1.442695, %v700_v17  ;;  %v713_v27 = vmul.f32 1.442695, %v701_v21  ;;  %v715_v30 = vmul.f32 1.442695, %v702_v26 }
 0x26c   : > { %1293 = vpow2.f32 %v705_v4  ;;  %v717_v35 = vmul.f32 1.442695, %v703_v29  ;;  %v719_v37 = vmul.f32 1.442695, %v704_v34 }
 0x26d   : > { %1295 = vpow2.f32 %v707_v12 }
 0x26e   : > { %1297 = vpow2.f32 %v709_v18 }
 0x26f   : > { %1299 = vpow2.f32 %v711_v22 }
 0x270   : > { %1301 = vpow2.f32 %v713_v27 }
 0x271   : > { %1303 = vpow2.f32 %v715_v30 }
 0x272   : > { %1305 = vpow2.f32 %v717_v35 }
 0x273   : > { %1307 = vpow2.f32 %v719_v37 }
 0x279   : > { %v1294_v32 = vpop.eup %1293 }
 0x27a   : > { %v1296_v33 = vpop.eup %1295  ;;  %730 = vperm.xlu1 %1290, %v1294_v32  }
 0x27b   : > { %733 = vperm.xlu0 %1291, %v1296_v33   ;;  %v1298_v36 = vpop.eup %1297 }
 0x27c   : > { %v1300_v38 = vpop.eup %1299 }
 0x27d   : > { %v1302_v39 = vpop.eup %1301 }
 0x27e   : > { %736 = vperm.xlu1 %1290, %v1298_v36   ;;  %v1304_v14 = vpop.eup %1303 }
 0x27f   : > { %v1306_v40 = vpop.eup %1305 }
 0x280   : > { %v1308_v41 = vpop.eup %1307 }
 0x282   : > { %739 = vperm.xlu1 %1290, %v1300_v38  }
 0x286   : > { %742 = vperm.xlu1 %1290, %v1302_v39  }
 0x28a   : > { %745 = vperm.xlu1 %1290, %v1304_v14  }
 0x28e   : > { %748 = vperm.xlu1 %1290, %v1306_v40  }
 0x292   : > { %751 = vperm.xlu1 %1290, %v1308_v41  }
 0x2f5   : > { %v731_v42 = vpop.permute.xlu1 %730 }
 0x2f6   : > { %v734_v46 = vpop.permute.xlu0 %733  ;;  %v756_v49 = vrot.slane %v731_v42, %v1757_v31 }
 0x2f7   : > { %v760_v48 = vrot.slane %v734_v46, %v1757_v31 }
 0x2f9   : > { %v737_v43 = vpop.permute.xlu1 %736  ;;  %v785_v54 = vsel %vm637_vm2, %v760_v48, %v756_v49 }
 0x2fa   : > { %v764_v50 = vrot.slane %v737_v43, %v1757_v31 }
 0x2fc   : > { %v786_v59 = vsel %vm639_vm3, %v764_v50, %v785_v54 }
 0x2fd   : > { %v740_v44 = vpop.permute.xlu1 %739 }
 0x2fe   : > { %v768_v51 = vrot.slane %v740_v44, %v1757_v31 }
 0x300   : > { %v787_v61 = vsel %vm641_vm4, %v768_v51, %v786_v59 }
 0x301   : > { %v743_v45 = vpop.permute.xlu1 %742 }
 0x302   : > { %v772_v52 = vrot.slane %v743_v45, %v1757_v31 }
 0x304   : > { %v788_v63 = vsel %vm643_vm5, %v772_v52, %v787_v61 }
 0x305   : > { %v746_v47 = vpop.permute.xlu1 %745 }
 0x306   : > { %v776_v58 = vrot.slane %v746_v47, %v1757_v31 }
 0x308   : > { %v789_v1 = vsel %vm645_vm6, %v776_v58, %v788_v63 }
 0x309   : > { %v749_v53 = vpop.permute.xlu1 %748 }
 0x30a   : > { %v780_v60 = vrot.slane %v749_v53, %v1757_v31 }
 0x30c   : > { %v790_v4 = vsel %vm647_vm7, %v780_v60, %v789_v1 }
 0x30d   : > { %v752_v0 = vpop.permute.xlu1 %751 }
 0x30e   : > { %v784_v3 = vrot.slane %v752_v0, %v1757_v31 }
 0x310   : > { %v791_v12 = vsel %vm649_vm8, %v784_v3, %v790_v4 }
 0x311   : > { %v793_v15 = vsel %vm652_vm9, %v791_v12, 0.0 }
 0x312   : > { %794 = vadd.xlane.f32.xlu1 %v793_v15 }
 0x39b   : > { %v795_v17 = vpop.xlane.xlu1 %794 }
 0x39c   : > { %1309 = vrcp.f32 %v795_v17 }
 0x3a9   : > { %v1310_v18 = vpop.eup %1309 }
 0x3aa   : > { %v801_v20 = vrot.slane %v1310_v18, %v1734_v24  ;;  %v805_v22 = vrot.slane %v1310_v18, %v663_v55  ;;  %v809_v26 = vrot.slane %v1310_v18, %v667_v56  ;;  %v813_v28 = vrot.slane %v1310_v18, %v671_v57 }
 0x3ab   : > { %v817_v30 = vrot.slane %v1310_v18, %v675_v62  ;;  %v821_v55 = vrot.slane %v1310_v18, %v679_v13  ;;  %v825_v56 = vrot.slane %v1310_v18, %v683_v19  ;;  %v829_v57 = vrot.slane %v1310_v18, %v687_v23 }
 0x3ac   : > { %v838_v21 = vmul.f32 %v1294_v32, %v801_v20  ;;  %v839_v25 = vmul.f32 %v1296_v33, %v805_v22  ;;  %v840_v27 = vmul.f32 %v1298_v36, %v809_v26  ;;  %v841_v29 = vmul.f32 %v1300_v38, %v813_v28 }
 0x3ad   : > { %v842_v24 = vmul.f32 %v1302_v39, %v817_v30  ;;  %v843_v32 = vmul.f32 %v1304_v14, %v821_v55  ;;  %v844_v33 = vmul.f32 %v1306_v40, %v825_v56  ;;  %v845_v34 = vmul.f32 %v1308_v41, %v829_v57 }
 0x3ae   : > { %848 = vperm.xlu0 %1291, %v838_v21  }
 0x3b2   : > { %853 = vperm.xlu0 %1291, %v839_v25  }
 0x3b6   : > { %858 = vperm.xlu0 %1291, %v840_v27  }
 0x3ba   : > { %863 = vperm.xlu0 %1291, %v841_v29  }
 0x3be   : > { %868 = vperm.xlu0 %1291, %v842_v24  }
 0x3c2   : > { %873 = vperm.xlu0 %1291, %v843_v32  }
 0x3c6   : > { %878 = vperm.xlu0 %1291, %v844_v33  }
 0x3ca   : > { %883 = vperm.xlu0 %1291, %v845_v34  }
 0x429   : > { %v849_v35 = vpop.permute.xlu0 %848 }
 0x42a   : > { %v886_v37 = vmul.f32 %v849_v35, %v1689_v2  ;;  %v953_v52 = vrot.slane %v849_v35, %v1757_v31 }
 0x42c   : > { %v894_v39 = vsel %vm318_vm0, %v886_v37, 0.0 }
 0x42d   : > { %v854_v62 = vpop.permute.xlu0 %853  ;;  %v895_v41 = vrot.slane %v894_v39, 4 }
 0x42e   : > { %v887_v36 = vmul.f32 %v854_v62, %v1694_v5 }
 0x42f   : > { %v896_v45 = vadd.f32 %v895_v41, %v894_v39 }
 0x430   : > { %v901_v19 = vsel %vm318_vm0, %v887_v36, 0.0 }
 0x431   : > { %v859_v13 = vpop.permute.xlu0 %858  ;;  %v902_v40 = vrot.slane %v901_v19, 4 }
 0x432   : > { %v888_v38 = vmul.f32 %v859_v13, %v1697_v6  ;;  %v961_v54 = vrot.slane %v859_v13, %v1757_v31 }
 0x433   : > { %v903_v6 = vadd.f32 %v902_v40, %v901_v19 }
 0x434   : > { %v908_v16 = vsel %vm318_vm0, %v888_v38, 0.0 }
 0x435   : > { %v864_v23 = vpop.permute.xlu0 %863  ;;  %v909_v42 = vrot.slane %v908_v16, 4  ;;  %v904_v53 = vrot.slane %v903_v6, 2 }
 0x436   : > { %v889_v14 = vmul.f32 %v864_v23, %v1713_v10  ;;  %v957_v10 = vrot.slane %v854_v62, %v1757_v31  ;;  %v965_v60 = vrot.slane %v864_v23, %v1757_v31 }
 0x437   : > { %v910_v46 = vadd.f32 %v909_v42, %v908_v16  ;;  %v905_v17 = vadd.f32 %v904_v53, %v903_v6 }
 0x438   : > { %v915_v5 = vsel %vm318_vm0, %v889_v14, 0.0  ;;  %v982_v3 = vsel %vm637_vm2, %v957_v10, %v953_v52 }
 0x439   : > { %v916_v43 = vrot.slane %v915_v5, 4  ;;  %v869_v2 = vpop.permute.xlu0 %868  ;;  %v911_v59 = vrot.slane %v910_v46, 2  ;;  %v983_v18 = vsel %vm639_vm3, %v961_v54, %v982_v3  ;;  %v906_v57 = vrot.slane %v905_v17, 1 }
 0x43a   : > { %v890_v44 = vmul.f32 %v869_v2, %v1700_v7  ;;  %v897_v7 = vrot.slane %v896_v45, 2  ;;  %v969_v0 = vrot.slane %v869_v2, %v1757_v31  ;;  %v984_v26 = vsel %vm641_vm4, %v965_v60, %v983_v18 }
 0x43b   : > { %v917_v48 = vadd.f32 %v916_v43, %v915_v5  ;;  %v912_v25 = vadd.f32 %v911_v59, %v910_v46 }
 0x43c   : > { %v922_v47 = vsel %vm318_vm0, %v890_v44, 0.0  ;;  %v898_v22 = vadd.f32 %v897_v7, %v896_v45  ;;  %v985_v29 = vsel %vm643_vm5, %v969_v0, %v984_v26 }
 0x43d   : > { %v923_v49 = vrot.slane %v922_v47, 4  ;;  %v874_v50 = vpop.permute.xlu0 %873  ;;  %v918_v63 = vrot.slane %v917_v48, 2  ;;  %v913_v36 = vrot.slane %v912_v25, 1 }
 0x43e   : > { %v891_v51 = vmul.f32 %v874_v50, %v1703_v8  ;;  %v973_v12 = vrot.slane %v874_v50, %v1757_v31  ;;  %v899_v38 = vrot.slane %v898_v22, 1 }
 0x43f   : > { %v924_v58 = vadd.f32 %v923_v49, %v922_v47  ;;  %v919_v28 = vadd.f32 %v918_v63, %v917_v48  ;;  %v914_v41 = vadd.f32 %v913_v36, %v912_v25 }
 0x440   : > { %v929_v61 = vsel %vm318_vm0, %v891_v51, 0.0  ;;  %v986_v32 = vsel %vm645_vm6, %v973_v12, %v985_v29  ;;  %v900_v42 = vadd.f32 %v899_v38, %v898_v22 }
 0x441   : > { %v930_v1 = vrot.slane %v929_v61, 4  ;;  %v879_v8 = vpop.permute.xlu0 %878  ;;  %v925_v4 = vrot.slane %v924_v58, 2  ;;  %v920_v19 = vrot.slane %v919_v28, 1 }
 0x442   : > { %v892_v15 = vmul.f32 %v879_v8, %v1708_v9  ;;  %v977_v21 = vrot.slane %v879_v8, %v1757_v31 }
 0x443   : > { %v931_v20 = vadd.f32 %v930_v1, %v929_v61  ;;  %v926_v9 = vadd.f32 %v925_v4, %v924_v58  ;;  %v921_v5 = vadd.f32 %v920_v19, %v919_v28 }
 0x444   : > { %v936_v27 = vsel %vm318_vm0, %v892_v15, 0.0  ;;  %v987_v62 = vsel %vm647_vm7, %v977_v21, %v986_v32 }
 0x445   : > { %v932_v30 = vrot.slane %v931_v20, 2  ;;  %v937_v24 = vrot.slane %v936_v27, 4  ;;  %v884_v55 = vpop.permute.xlu0 %883  ;;  %v927_v23 = vrot.slane %v926_v9, 1 }
 0x446   : > { %v893_v56 = vmul.f32 %v884_v55, %v1722_v11  ;;  %v981_v33 = vrot.slane %v884_v55, %v1757_v31  ;;  %v907_v11 = vadd.f32 %v906_v57, %v905_v17 }
 0x447   : > { %v933_v34 = vadd.f32 %v932_v30, %v931_v20  ;;  %v938_v35 = vadd.f32 %v937_v24, %v936_v27  ;;  %v928_v44 = vadd.f32 %v927_v23, %v926_v9 }
 0x448   : > { %v943_v37 = vsel %vm318_vm0, %v893_v56, 0.0  ;;  %v988_v13 = vsel %vm649_vm8, %v981_v33, %v987_v62  ;;  %v999_v6 = vsel %vm637_vm2, %v907_v11, %v900_v42 }
 0x449   : > { %v939_v39 = vrot.slane %v938_v35, 2  ;;  %v944_v16 = vrot.slane %v943_v37, 4  ;;  %990 = vst.msk [vmem:[%s305_s6] sm:$0xff] %vm652_vm9, %v988_v13  ;;  %v934_v14 = vrot.slane %v933_v34, 1  ;;  %v1000_v47 = vsel %vm639_vm3, %v914_v41, %v999_v6 }
 0x44a   : > { %v1001_v49 = vsel %vm641_vm4, %v921_v5, %v1000_v47 }
 0x44b   : > { %v940_v31 = vadd.f32 %v939_v39, %v938_v35  ;;  %v945_v40 = vadd.f32 %v944_v16, %v943_v37  ;;  %v935_v45 = vadd.f32 %v934_v14, %v933_v34  ;;  %v1002_v10 = vsel %vm643_vm5, %v928_v44, %v1001_v49 }
 0x44d   : > { %v941_v43 = vrot.slane %v940_v31, 1  ;;  %v946_v2 = vrot.slane %v945_v40, 2  ;;  %v1003_v51 = vsel %vm645_vm6, %v935_v45, %v1002_v10 }
 0x44f   : > { %v947_v46 = vadd.f32 %v946_v2, %v945_v40  ;;  %v942_v48 = vadd.f32 %v941_v43, %v940_v31 }
 0x451   : > { %v948_v50 = vrot.slane %v947_v46, 1  ;;  %v1004_v53 = vsel %vm647_vm7, %v942_v48, %v1003_v51 }
 0x453   : > { %v949_v52 = vadd.f32 %v948_v50, %v947_v46 }
 0x455   : > { %v1005_v54 = vsel %vm649_vm8, %v949_v52, %v1004_v53 }
 0x456   : > { %1007 = vst.msk [vmem:[%s294_s0] sm:$0xff] %vm318_vm0, %v1005_v54 }
 0x457   : > { %1406 = shalt.err (!%p1403_p1)
}
 0x458   : > { %s1407_s29 = scalar_lea.hbm %s1880_s11, 128  ;;  %s1411_s17 = scalar_lea.hbm %s1923_s4, 256 }
 0x459   : > { %p1408_p4 = scmp.ne.s32.totalorder %s1880_s11, %s1407_s29  ;;  %p1412_p8 = scmp.lt.s32.totalorder %s1880_s11, %s1923_s4 }
 0x45a   : > { %p1413_p11 = scmp.lt.s32.totalorder %s1411_s17, %s1407_s29 }
 0x45b   : > { %p1409_p6 = pnand %p1408_p4, %p1947_p12 }
 0x45c   : > { %p1414_p3 = por %p1413_p11, %p1412_p8 }
 0x45d   : > { %p1410_p7 = pneg %p1409_p6 }
 0x45f   : > { %p1415_p9 = pnand %p1414_p3, %p1410_p7 }
 0x461   : > { %1418 = shalt.err (!%p1415_p9)
}
 0x462   : > { %1232 = dma.vmem_to_hbm [thread:$0]  (%p1947_p12), %s1027_s23, 128, %s1880_s11, %s1009_s22  }
 0x463 PF: > { %s1041_s15 = sand.u32 1, %s1453_s18   ;;  %p1948_p13 = scmp.ne.s32.totalorder %s1932_s25, 0 }
 0x464   : > { %p1949_p0 = scmp.ge.s32.totalorder %s1465_s21, 2  ;;  %s1042_s28 = scalar_lea.sflag [#allocation4], %s1041_s15 }
 0x466   : > { %p1246_p5 = pnand %p1949_p0, %p1948_p13 }
 0x468   : > { %p1247_p2 = pneg %p1246_p5 }
 0x46a   : > { %1448 = dma.done.wait (%p1247_p2), %s1042_s28, 128  }
 0x46b   : > { %1450 = vsyncadd (%p1247_p2), %s1042_s28, 4294967168  ;;  %s1950_s6 = sld [smem:[#allocation13_spill]]  ;;  %p22_p10 = scmp.ge.s32.totalorder %s1559_s30, 4  }
 0x46c   : > { %s1951_s18 = smov %s1457_s19  ;;  %s1952_s19 = smov %s1461_s20 }
 0x46d   : > { %s1954_s21 = smov %s1559_s30  ;;  %24 = sbr.rel (!%p22_p10) target bundleno = 10 (0xa), region = 110 }
 0x471   : > { %s1953_s20 = smov %s1950_s6 }
 0x472   :  { %1054 = vsyncpa [#allocation3], 1 }
 0x473   :  { %1056 = vsyncpa [#allocation3 + $0x1], 1 }
 0x474   :  { %1057 = vsyncpa [#allocation6], 1 }
 0x475   :  { %1059 = vsyncpa [#allocation6 + $0x1], 1 }
 0x476   :  { %1060 = vsyncpa [#allocation4], 1 }
 0x477   :  { %1062 = vsyncpa [#allocation4 + $0x1], 1 }

</bundles_post_ra>
